<compile_context>
chip_gen: v7x
topology: tpu7x:2x2x1
jax: 0.10.0
libtpu: 0.0.40
codegen_flags: <defaults>
</compile_context>

<pallas_src>
import functools

import jax
import jax.numpy as jnp
from jax.experimental import pallas as pl
from jax.experimental.pallas import tpu as pltpu


def _round_up(x, m):
    return (x + m - 1) // m * m


def _linear_relu_kernel(x_ref, w_ref, b_ref, out_ref):
    """h0 = relu(x @ W + b) for one row tile.

    x_ref:   [TM, in_dim]    f32
    w_ref:   [in_dim, Epad]  f32 (full, resident)
    b_ref:   [1, Epad]       f32
    out_ref: [TM, Epad]      bf16 (lane-dense)
    """
    h = jnp.dot(x_ref[...], w_ref[...], preferred_element_type=jnp.float32)
    h = jnp.maximum(h + b_ref[...], 0.0)
    out_ref[...] = h.astype(out_ref.dtype)


def _spmm_kernel(a_ref, h_ref, out_ref, acc_ref):
    """One (row_tile, k_tile) step of h_new = A @ h with f32 accumulation.

    a_ref:   [TM, TK]   bf16 adjacency tile (dst rows, src cols)
    h_ref:   [TK, Epad] bf16 current node features
    out_ref: [TM, Epad] bf16
    acc_ref: [TM, Epad] f32 VMEM scratch accumulator
    """
    @pl.when(pl.program_id(1) == 0)
    def _():
        acc_ref[...] = jnp.zeros_like(acc_ref)

    acc_ref[...] += jnp.dot(a_ref[...], h_ref[...],
                            preferred_element_type=jnp.float32)

    @pl.when(pl.program_id(1) == pl.num_programs(1) - 1)
    def _():
        out_ref[...] = acc_ref[...].astype(out_ref.dtype)


def sgc_forward(x, adj, weight, bias, *, k, prop_dtype=jnp.bfloat16):
    """x: [N, in_dim] f32, adj: [N, N] dense weighted adjacency (row = dst),
    weight: [in_dim, emb_dim] (torch W.T), bias: [emb_dim].
    Returns [N, in_dim + k*emb_dim] float32."""
    n, in_dim = x.shape
    emb_dim = weight.shape[1]

    # --- padding / tiling constants (sized to fit v7x's 64 MiB VMEM too) ---
    n_pad = _round_up(max(n, 8), 128)
    emb_pad = _round_up(emb_dim, 128)
    tm = 256 if n_pad % 256 == 0 else 128      # row tile
    tk = 512 if n_pad % 512 == 0 else tm       # contraction tile
    vmem_limit = 32 * 1024 * 1024              # safe on v5e/v6e/v7x

    # Pad once in the wrapper (zero-padded rows/cols contribute nothing).
    x_p = jnp.zeros((n_pad, in_dim), jnp.float32).at[:n, :].set(
        x.astype(jnp.float32))
    w_p = jnp.zeros((in_dim, emb_pad), jnp.float32).at[:, :emb_dim].set(
        weight.astype(jnp.float32))
    b_p = jnp.zeros((1, emb_pad), jnp.float32).at[0, :emb_dim].set(
        bias.astype(jnp.float32))
    a_p = jnp.zeros((n_pad, n_pad), prop_dtype).at[:n, :n].set(
        adj.astype(prop_dtype))
    itemsize = jnp.dtype(prop_dtype).itemsize

    # --- linear + ReLU (tiled over rows, lane-dense bf16 output) ---
    h = pl.pallas_call(
        _linear_relu_kernel,
        out_shape=jax.ShapeDtypeStruct((n_pad, emb_pad), prop_dtype),
        grid_spec=pltpu.PrefetchScalarGridSpec(
            num_scalar_prefetch=0,
            grid=(n_pad // tm,),
            in_specs=[
                pl.BlockSpec((tm, in_dim), lambda i: (i, 0)),
                pl.BlockSpec((in_dim, emb_pad), lambda i: (0, 0)),
                pl.BlockSpec((1, emb_pad), lambda i: (0, 0)),
            ],
            out_specs=pl.BlockSpec((tm, emb_pad), lambda i: (i, 0)),
        ),
        compiler_params=pltpu.CompilerParams(
            dimension_semantics=("parallel",),
            vmem_limit_bytes=vmem_limit,
        ),
        cost_estimate=pl.CostEstimate(
            flops=2 * n_pad * in_dim * emb_pad,
            transcendentals=0,
            bytes_accessed=(n_pad * in_dim * 4 + in_dim * emb_pad * 4
                            + n_pad * emb_pad * itemsize),
        ),
    )(x_p, w_p, b_p)

    # --- one tiled propagation matmul per hop: h <- A @ h ---
    prop = pl.pallas_call(
        _spmm_kernel,
        out_shape=jax.ShapeDtypeStruct((n_pad, emb_pad), prop_dtype),
        grid_spec=pltpu.PrefetchScalarGridSpec(
            num_scalar_prefetch=0,
            grid=(n_pad // tm, n_pad // tk),
            in_specs=[
                pl.BlockSpec((tm, tk), lambda i, j: (i, j)),        # A tile
                pl.BlockSpec((tk, emb_pad), lambda i, j: (j, 0)),   # h slab
            ],
            out_specs=pl.BlockSpec((tm, emb_pad), lambda i, j: (i, 0)),
            scratch_shapes=[pltpu.VMEM((tm, emb_pad), jnp.float32)],
        ),
        compiler_params=pltpu.CompilerParams(
            dimension_semantics=("parallel", "arbitrary"),
            vmem_limit_bytes=vmem_limit,
        ),
        cost_estimate=pl.CostEstimate(
            flops=2 * n_pad * n_pad * emb_pad,
            transcendentals=0,
            bytes_accessed=(n_pad * n_pad * itemsize
                            + 2 * n_pad * emb_pad * itemsize),
        ),
    )

    hops = []
    for _ in range(k):
        h = prop(a_p, h)
        hops.append(h)

    # concat(x, h_1..h_k) + un-padding in the wrapper (kernels stay lane-dense).
    outs = [x.astype(jnp.float32)]
    outs += [hp[:n, :emb_dim].astype(jnp.float32) for hp in hops]
    return jnp.concatenate(outs, axis=1)


def sgc_reference(x, adj, weight, bias, *, k, prop_dtype=jnp.bfloat16):
    """Pure-JAX reference matching the kernel's precision (bf16 propagation,
    f32 accumulation)."""
    outs = [x.astype(jnp.float32)]
    h = jnp.maximum(x @ weight + bias, 0.0).astype(prop_dtype)
    a = adj.astype(prop_dtype)
    for _ in range(k):
        h = jnp.dot(a, h, preferred_element_type=jnp.float32).astype(prop_dtype)
        outs.append(h.astype(jnp.float32))
    return jnp.concatenate(outs, axis=1)


def sgc_reference_f32(x, adj, weight, bias, *, k):
    """Full-f32 reference of the PyTorch forward (semantic check, loose tol)."""
    outs = [x]
    h = jnp.maximum(x @ weight + bias, 0.0)
    for _ in range(k):
        h = adj @ h
        outs.append(h)
    return jnp.concatenate(outs, axis=1)


if __name__ == "__main__":
    # Small synthetic problem: N=8 nodes, in_dim=16, emb_dim=32, k=3 layers.
    N, IN_DIM, EMB_DIM, K = 8, 16, 32, 3
    # TODO(synk): dropout is defined in __init__ but never applied in forward; omitted.

    key = jax.random.PRNGKey(0)
    kx, ka, kw, kb = jax.random.split(key, 4)

    x = jax.random.normal(kx, (N, IN_DIM), dtype=jnp.float32)
    # Dense weighted adjacency (analogue of DGL edge weights 'w': A[v,u] = w(u->v)).
    adj = jax.random.uniform(ka, (N, N), dtype=jnp.float32)
    # torch Linear: y = x @ W.T + b ; we store W.T as [in_dim, emb_dim].
    weight = jax.random.normal(kw, (IN_DIM, EMB_DIM), dtype=jnp.float32) * 0.1
    bias = jax.random.normal(kb, (EMB_DIM,), dtype=jnp.float32) * 0.1

    out = sgc_forward(x, adj, weight, bias, k=K)
    out = jax.block_until_ready(out)
    assert out.shape == (N, IN_DIM + K * EMB_DIM), out.shape

    # Precision-matched reference (same bf16-propagation semantics as kernel).
    ref = sgc_reference(x, adj, weight, bias, k=K)
    assert jnp.allclose(out, ref, atol=2e-2, rtol=2e-2), "mismatch vs bf16 reference"

    # Loose check against the full-f32 PyTorch semantics.
    ref32 = sgc_reference_f32(x, adj, weight, bias, k=K)
    assert jnp.allclose(out, ref32, atol=0.2, rtol=5e-2), "mismatch vs f32 reference"

    print("KERNEL_OK")
</pallas_src>

<mosaic_0001>
module attributes {stable_mosaic.version = 11 : i64} {
  func.func @_linear_relu_kernel(%arg0: i32, %arg1: memref<128x16xf32, #tpu.memory_space<vmem>>, %arg2: memref<16x128xf32, #tpu.memory_space<vmem>>, %arg3: memref<1x128xf32, #tpu.memory_space<vmem>>, %arg4: memref<128x128xbf16, #tpu.memory_space<vmem>>) attributes {dimension_semantics = [#tpu.dimension_semantics<parallel>], iteration_bounds = array<i64: 1>, scalar_prefetch = 0 : i64, scratch_operands = 0 : i64, tpu.core_type = #tpu.core_type<tc>, window_params = [{transform_indices = @transform_0, window_bounds = array<i64: 128, 16>}, {pipeline_mode = #tpu.pipeline_mode<synchronous>, transform_indices = @transform_1, window_bounds = array<i64: 16, 128>}, {pipeline_mode = #tpu.pipeline_mode<synchronous>, transform_indices = @transform_2, window_bounds = array<i64: 1, 128>}, {transform_indices = @transform_3, window_bounds = array<i64: 128, 128>}]} {
    %c0 = arith.constant 0 : index
    %c0_0 = arith.constant 0 : index
    %0 = vector.load %arg1[%c0, %c0_0] : memref<128x16xf32, #tpu.memory_space<vmem>>, vector<128x16xf32>
    %c0_1 = arith.constant 0 : index
    %c0_2 = arith.constant 0 : index
    %1 = vector.load %arg2[%c0_1, %c0_2] : memref<16x128xf32, #tpu.memory_space<vmem>>, vector<16x128xf32>
    %cst = arith.constant dense<0.000000e+00> : vector<128x128xf32>
    %2 = tpu.matmul %0, %1, %cst {dimension_numbers = #tpu.dot_dimension_numbers<[1], [0], [0], [1], [0, 0, 1, 1], [], []>} : vector<128x16xf32>, vector<16x128xf32>, vector<128x128xf32> -> vector<128x128xf32>
    %c0_3 = arith.constant 0 : index
    %c0_4 = arith.constant 0 : index
    %3 = vector.load %arg3[%c0_3, %c0_4] : memref<1x128xf32, #tpu.memory_space<vmem>>, vector<1x128xf32>
    %4 = vector.broadcast %3 : vector<1x128xf32> to vector<128x128xf32>
    %5 = arith.addf %2, %4 : vector<128x128xf32>
    %cst_5 = arith.constant 0.000000e+00 : f32
    %6 = vector.broadcast %cst_5 : f32 to vector<128x128xf32>
    %7 = arith.maximumf %5, %6 : vector<128x128xf32>
    %8 = arith.truncf %7 : vector<128x128xf32> to vector<128x128xbf16>
    %c0_6 = arith.constant 0 : index
    %c0_7 = arith.constant 0 : index
    %9 = vector.load %arg4[%c0_6, %c0_7] : memref<128x128xbf16, #tpu.memory_space<vmem>>, vector<128x128xbf16>
    tpu.vector_store %arg4[%c0_6, %c0_7], %8 {strides = array<i32>} : memref<128x128xbf16, #tpu.memory_space<vmem>>, vector<128x128xbf16>,
    return
  }
  func.func @transform_0(%arg0: i32) -> (i32, i32) {
    %c0_i32 = arith.constant 0 : i32
    %c0_i32_0 = arith.constant 0 : i32
    return %arg0, %c0_i32 : i32, i32
  }
  func.func @transform_1(%arg0: i32) -> (i32, i32) {
    %c0_i32 = arith.constant 0 : i32
    %c0_i32_0 = arith.constant 0 : i32
    %c0_i32_1 = arith.constant 0 : i32
    return %c0_i32, %c0_i32_0 : i32, i32
  }
  func.func @transform_2(%arg0: i32) -> (i32, i32) {
    %c0_i32 = arith.constant 0 : i32
    %c0_i32_0 = arith.constant 0 : i32
    %c0_i32_1 = arith.constant 0 : i32
    return %c0_i32, %c0_i32_0 : i32, i32
  }
  func.func @transform_3(%arg0: i32) -> (i32, i32) {
    %c0_i32 = arith.constant 0 : i32
    %c0_i32_0 = arith.constant 0 : i32
    return %arg0, %c0_i32 : i32, i32
  }
}

</mosaic_0001>

<bundles_post_ra>
// kernel: tpu_custom_call.1
= control target key start
LH: loop header
LB: loop body
LE: loop exit
PB: predicated region body
PF: predicated region fallthrough
CT: control target
= control target key end

     0   :  { %vm40_vm0 = vcmask 130048   ;;  %s629_s0 = inlined_call_operand.vmem [shape: f32[128,16], index: 0, kind: input, shape index: {}]   ;;  %s630_s1 = inlined_call_operand.vmem [shape: f32[16,128], index: 1, kind: input, shape index: {}]   ;;  %s631_s2 = inlined_call_operand.vmem [shape: f32[1,128], index: 2, kind: input, shape index: {}]   ;;  %s632_s3 = inlined_call_operand.hbm [shape: bf16[128,128], index: 3, kind: output, shape index: {}]  }
   0x1   :  { %v31_v0 = vld [vmem:[%s630_s1] sm:$0xff]  ;;  %v32_v1 = vld [vmem:[%s630_s1 + $0x8] sm:$0xff]  ;;  %v17_v7 = vld [vmem:[%s629_s0 + $0x10] sm:$0xff] }
   0x2   :  { %v15_v2 = vld [vmem:[%s629_s0] sm:$0xff]  ;;  %v488_v3 = vpack.c.bf16 %v32_v1, %v31_v0  ;;  %v16_v5 = vld [vmem:[%s629_s0 + $0x8] sm:$0xff]  ;;  %v25_v8 = vld [vmem:[%s629_s0 + $0x50] sm:$0xff] }
   0x3   :  { %464 = vmatprep.mubr.msk.f32.mxu0 %vm40_vm0, %v15_v2  ;;  %v23_v4 = vld [vmem:[%s629_s0 + $0x40] sm:$0xff]  ;;  %v24_v6 = vld [vmem:[%s629_s0 + $0x48] sm:$0xff] }
   0x4   :  { %476 = vmatprep.mubr.msk.f32.mxu1 %vm40_vm0, %v23_v4  ;;  %489 = vmatprep.subr.bf16.mxu0 %v488_v3 }
   0x5   :  { %492 = vmatprep.subr.bf16.mxu1 %v488_v3  ;;  %491 = vmatpush3.bf16.msra.mxu0 %v488_v3 }
   0x6   :  { %493 = vmatpush3.bf16.msra.mxu1 %v488_v3 }
   0x7   :  { %8 = vsyncpa [#allocation3], 0  ;;  %v18_v9 = vld [vmem:[%s629_s0 + $0x18] sm:$0xff]  ;;  %v19_v11 = vld [vmem:[%s629_s0 + $0x20] sm:$0xff] }
   0x8   :  { %465 = vmatmul.mubr.msk.f32.vlgmr.msra.gmra.mrb[0].mxu0 %vm40_vm0, %v16_v5  ;;  %v26_v10 = vld [vmem:[%s629_s0 + $0x58] sm:$0xff]  ;;  %v27_v12 = vld [vmem:[%s629_s0 + $0x60] sm:$0xff]  ;;  %v20_v13 = vld [vmem:[%s629_s0 + $0x28] sm:$0xff] }
   0x9   :  { %477 = vmatmul.mubr.msk.f32.vlgmr.msra.gmra.mrb[0].mxu1 %vm40_vm0, %v24_v6  ;;  %467 = vmatprep.mubr.msk.f32.mxu0 %vm40_vm0, %v17_v7  ;;  %v28_v14 = vld [vmem:[%s629_s0 + $0x68] sm:$0xff]  ;;  %v21_v15 = vld [vmem:[%s629_s0 + $0x30] sm:$0xff]  ;;  %v22_v17 = vld [vmem:[%s629_s0 + $0x38] sm:$0xff] }
   0xa   :  { %479 = vmatprep.mubr.msk.f32.mxu1 %vm40_vm0, %v25_v8  ;;  %v29_v16 = vld [vmem:[%s629_s0 + $0x70] sm:$0xff]  ;;  %v30_v18 = vld [vmem:[%s629_s0 + $0x78] sm:$0xff]  ;;  %v346_v19 = vld [vmem:[%s631_s2] ss:$0 sm:$0xff]  ;;  %s521_s0 = smov [#allocation2]  }
   0xb   :  { %s335_s2 = sshll.u32 %s521_s0, 4  ;;  %s336_s2 = int_to_ptr.vmem [resolvable:$true] %s335_s2 }
   0xc   :  { %468 = vmatmul.mubr.msk.f32.gmra.mrb[2].mxu0 %vm40_vm0, %v18_v9  ;;  %s497_s21 = scalar_lea.vmem %s336_s2, 1024  ;;  %p502_p1 = scmp.lt.s32.totalorder %s336_s2, %s336_s2 }
   0xd   :  { %480 = vmatmul.mubr.msk.f32.gmra.mrb[2].mxu1 %vm40_vm0, %v26_v10  ;;  %470 = vmatprep.mubr.msk.f32.mxu0 %vm40_vm0, %v19_v11  ;;  %p498_p0 = scmp.ne.s32.totalorder %s336_s2, %s497_s21  ;;  %p503_p2 = scmp.lt.s32.totalorder %s497_s21, %s497_s21 }
   0xe   :  { %482 = vmatprep.mubr.msk.f32.mxu1 %vm40_vm0, %v27_v12 }
   0xf   :  { %p504_p3 = por %p503_p2, %p502_p1 }
  0x10   :  { %471 = vmatmul.mubr.msk.f32.gmra.mrb[4].mxu0 %vm40_vm0, %v20_v13 }
  0x11   :  { %483 = vmatmul.mubr.msk.f32.gmra.mrb[4].mxu1 %vm40_vm0, %v28_v14  ;;  %473 = vmatprep.mubr.msk.f32.mxu0 %vm40_vm0, %v21_v15  ;;  %p505_p4 = pnand %p504_p3, %p498_p0 }
  0x12   :  { %485 = vmatprep.mubr.msk.f32.mxu1 %vm40_vm0, %v29_v16 }
  0x14   :  { %474 = vmatmul.mubr.msk.f32.gmra.mrb[6].mxu0 %vm40_vm0, %v22_v17 }
  0x15   :  { %486 = vmatmul.mubr.msk.f32.gmra.mrb[6].mxu1 %vm40_vm0, %v30_v18 }
  0xdb   :  { %v466_v20 = vpop.f32.mrb[0].mxu0 }
  0xdc   :  { %v478_v21 = vpop.f32.mrb[0].mxu1  ;;  %v161_v22 = vadd.f32 %v466_v20, %v346_v19  ;;  %v155_v24 = vpop.f32.mrb[1].mxu0 }
  0xdd   :  { %v201_v23 = vadd.f32 %v478_v21, %v346_v19  ;;  %v195_v25 = vpop.f32.mrb[1].mxu1  ;;  %v156_v26 = vadd.f32 %v346_v19, %v155_v24 }
  0xde   :  { %v196_v27 = vadd.f32 %v346_v19, %v195_v25  ;;  %v235_v28 = vmax.f32 %v161_v22, 0.0 }
  0xdf   :  { %v243_v29 = vmax.f32 %v201_v23, 0.0  ;;  %v234_v30 = vmax.f32 %v156_v26, 0.0  ;;  %v469_v32 = vpop.f32.mrb[2].mxu0 }
  0xe0   :  { %v242_v31 = vmax.f32 %v196_v27, 0.0  ;;  %v481_v33 = vpop.f32.mrb[2].mxu1  ;;  %v171_v34 = vadd.f32 %v469_v32, %v346_v19  ;;  %v165_v36 = vpop.f32.mrb[3].mxu0 }
  0xe1   :  { %v211_v35 = vadd.f32 %v481_v33, %v346_v19  ;;  %v205_v37 = vpop.f32.mrb[3].mxu1  ;;  %v398_v38 = vpack.c.bf16 %v235_v28, %v234_v30  ;;  %v166_v40 = vadd.f32 %v346_v19, %v165_v36 }
  0xe2   :  { %v418_v39 = vpack.c.bf16 %v243_v29, %v242_v31  ;;  %v206_v41 = vadd.f32 %v346_v19, %v205_v37  ;;  %v237_v42 = vmax.f32 %v171_v34, 0.0 }
  0xe3   :  { %v245_v43 = vmax.f32 %v211_v35, 0.0  ;;  %399 = vst [vmem:[#allocation2] sm:$0xff] %v398_v38   ;;  %v236_v44 = vmax.f32 %v166_v40, 0.0  ;;  %v472_v46 = vpop.f32.mrb[4].mxu0 }
  0xe4   :  { %438 = vst [vmem:[#allocation2 + $0x20] sm:$0xff] %v418_v39   ;;  %v244_v45 = vmax.f32 %v206_v41, 0.0  ;;  %v484_v47 = vpop.f32.mrb[4].mxu1  ;;  %v181_v48 = vadd.f32 %v472_v46, %v346_v19  ;;  %v175_v50 = vpop.f32.mrb[5].mxu0 }
  0xe5   :  { %v221_v49 = vadd.f32 %v484_v47, %v346_v19  ;;  %v215_v51 = vpop.f32.mrb[5].mxu1  ;;  %v403_v52 = vpack.c.bf16 %v237_v42, %v236_v44  ;;  %v176_v54 = vadd.f32 %v346_v19, %v175_v50 }
  0xe6   :  { %v423_v53 = vpack.c.bf16 %v245_v43, %v244_v45  ;;  %v216_v55 = vadd.f32 %v346_v19, %v215_v51  ;;  %v239_v56 = vmax.f32 %v181_v48, 0.0 }
  0xe7   :  { %v247_v57 = vmax.f32 %v221_v49, 0.0  ;;  %435 = vst [vmem:[#allocation2 + $0x8] sm:$0xff] %v403_v52   ;;  %v238_v58 = vmax.f32 %v176_v54, 0.0  ;;  %v475_v60 = vpop.f32.mrb[6].mxu0 }
  0xe8   :  { %439 = vst [vmem:[#allocation2 + $0x28] sm:$0xff] %v423_v53   ;;  %v246_v59 = vmax.f32 %v216_v55, 0.0  ;;  %v487_v61 = vpop.f32.mrb[6].mxu1  ;;  %v191_v62 = vadd.f32 %v475_v60, %v346_v19  ;;  %v185_v0 = vpop.f32.mrb[7].mxu0 }
  0xe9   :  { %v231_v63 = vadd.f32 %v487_v61, %v346_v19  ;;  %v225_v1 = vpop.f32.mrb[7].mxu1  ;;  %v408_v2 = vpack.c.bf16 %v239_v56, %v238_v58  ;;  %v186_v4 = vadd.f32 %v346_v19, %v185_v0 }
  0xea   :  { %v428_v3 = vpack.c.bf16 %v247_v57, %v246_v59  ;;  %v226_v5 = vadd.f32 %v346_v19, %v225_v1  ;;  %v241_v6 = vmax.f32 %v191_v62, 0.0 }
  0xeb   :  { %v249_v7 = vmax.f32 %v231_v63, 0.0  ;;  %436 = vst [vmem:[#allocation2 + $0x10] sm:$0xff] %v408_v2   ;;  %v240_v8 = vmax.f32 %v186_v4, 0.0 }
  0xec   :  { %440 = vst [vmem:[#allocation2 + $0x30] sm:$0xff] %v428_v3   ;;  %v248_v9 = vmax.f32 %v226_v5, 0.0 }
  0xed   :  { %v413_v10 = vpack.c.bf16 %v241_v6, %v240_v8 }
  0xee   :  { %v433_v11 = vpack.c.bf16 %v249_v7, %v248_v9 }
  0xef   :  { %437 = vst [vmem:[#allocation2 + $0x18] sm:$0xff] %v413_v10  }
  0xf0   :  { %441 = vst [vmem:[#allocation2 + $0x38] sm:$0xff] %v433_v11  }
  0xf1   :  { %508 = shalt.err (!%p505_p4)
}
  0xf2   :  { %s509_s24 = scalar_lea.hbm %s632_s3, 1024 }
  0xf3   :  { %p510_p5 = scmp.ne.s32.totalorder %s632_s3, %s509_s24  ;;  %p513_p6 = scmp.lt.u32.totalorder %s509_s24, %s632_s3 }
  0xf5   :  { %p515_p7 = pnand %p513_p6, %p510_p5 }
  0xf7   :  { %518 = shalt.err (!%p515_p7)
}
  0xf8   :  { %s522_s29 = smov 64   ;;  %s523_s30 = smov 4  }
  0xf9   :  { %341 = dma.vmem_to_hbm [thread:$0]  %s336_s2, 1024, %s632_s3, [#allocation3], %s522_s29, %s522_s29, %s523_s30  }
  0xfa   :  { %519 = dma.done.wait [#allocation3], 1024  }
  0xfb   :  { %520 = vsyncadd [#allocation3], 4294966272 }
  0xfc   :  { %345 = vsyncpa [#allocation3], 1 }

</bundles_post_ra>
